<compile_context>
chip_gen: v5e
topology: v5e:2x2
jax: 0.10.0
libtpu: 0.0.40
codegen_flags: <defaults>
</compile_context>

<pallas_src>
import functools

import jax
import jax.numpy as jnp
from jax.experimental import pallas as pl
from jax.experimental.pallas import tpu as pltpu

EPS = 1e-5  # nn.BatchNorm1d default


def _shortcut_kernel(
    x_ref,    # (C, Nt)   input tile (batch dim squeezed away)
    w1_ref,   # (H, C)    conv1 weight
    b1_ref,   # (H, 1)    conv1 bias
    w2_ref,   # (C, H)    conv2 weight with BN2 scale folded in
    pc_ref,   # (4, C, 1) packed per-channel params: [scale1, bias1, scale2, bias2']
    o_ref,    # (C, Nt)
    h_ref,    # (H, Nt)   VMEM scratch for the hidden activation
):
    x = x_ref[...]                 # (C, Nt) f32

    s1 = pc_ref[0]                 # (C, 1)
    c1 = pc_ref[1]
    s2 = pc_ref[2]
    c2 = pc_ref[3]

    # fused: BN1(x + x) == x * scale1 + bias1
    y = x * s1 + c1

    # conv1 (1x1) + bias -> relu, staged through VMEM scratch
    h_ref[...] = jnp.maximum(
        jnp.dot(w1_ref[...], y, preferred_element_type=jnp.float32) + b1_ref[...],
        0.0,
    )

    # conv2 with BN2 scale folded into weights/bias, plus BN2-scaled residual:
    # out = scale2*y + (scale2*W2) @ h + (scale2*b2 + bias2)
    o_ref[...] = (
        y * s2
        + jnp.dot(w2_ref[...], h_ref[...], preferred_element_type=jnp.float32)
        + c2
    ).astype(o_ref.dtype)


def _fold_params(params, eps=EPS):
    """Fold the residual doubling + both BatchNorms into affine params / conv2."""
    inv1 = jax.lax.rsqrt(params["v1"] + eps)               # (C, 1)
    scale1 = 2.0 * params["g1"] * inv1                     # absorbs x = x + x
    bias1 = params["be1"] - params["m1"] * params["g1"] * inv1

    inv2 = jax.lax.rsqrt(params["v2"] + eps)
    scale2 = params["g2"] * inv2
    bias2 = params["be2"] - params["m2"] * params["g2"] * inv2

    w2p = scale2 * params["w2"]                            # (C, H)
    b2p = scale2 * params["b2"] + bias2                    # (C, 1)

    packed = jnp.stack([scale1, bias1, scale2, b2p], axis=0)   # (4, C, 1)
    return params["w1"], params["b1"], w2p, packed


def _pick_tile(C, H, N, *, lane_budget_bytes=10 << 20, max_tile=32768):
    """Lane tile sized so (dbl-buffered x + out blocks + h scratch) ~ budget."""
    per_lane_bytes = (4 * C + H) * 4          # 2*x + 2*out + h, all f32
    tile = min(max_tile, max(128, lane_budget_bytes // per_lane_bytes))
    if tile >= N:
        return N                              # full-extent block: no padding at all
    return max(128, (tile // 128) * 128)      # multiple of 128; last block masked


@functools.partial(jax.jit, static_argnames=("max_tile",))
def shortcut_layer(x, params, *, max_tile=32768):
    """x: (B, C, N) float32.  params: dict of conv weights / BN stats."""
    B, C, N = x.shape
    H = params["w1"].shape[0]

    w1, b1, w2p, pc = _fold_params(params)

    tile = _pick_tile(C, H, N, max_tile=max_tile)
    grid = (B, pl.cdiv(N, tile))

    # VMEM budget: double-buffered x + out tiles, h scratch, resident weights.
    vmem_bytes = (
        2 * 2 * C * tile * 4
        + H * tile * 4
        + 2 * (H * C + H + C * H + 4 * C) * 4
    )
    vmem_limit = min(96 << 20, max(32 << 20, int(vmem_bytes * 1.5)))

    L = B * N
    cost = pl.CostEstimate(
        flops=4 * C * H * L,                                 # two 1x1-conv matmuls
        transcendentals=0,
        bytes_accessed=2 * C * L * 4 + (2 * H * C + H + 4 * C) * 4,
    )

    return pl.pallas_call(
        _shortcut_kernel,
        out_shape=jax.ShapeDtypeStruct((B, C, N), x.dtype),
        grid_spec=pltpu.PrefetchScalarGridSpec(
            num_scalar_prefetch=0,
            grid=grid,
            in_specs=[
                # native layout: (B, C, N) tiled over batch and lane axes
                pl.BlockSpec((pl.Squeezed(), C, tile), lambda b, n: (b, 0, n)),
                pl.BlockSpec((H, C), lambda b, n: (0, 0)),        # conv1 weight (resident)
                pl.BlockSpec((H, 1), lambda b, n: (0, 0)),        # conv1 bias
                pl.BlockSpec((C, H), lambda b, n: (0, 0)),        # conv2 weight (BN2-folded)
                pl.BlockSpec((4, C, 1), lambda b, n: (0, 0, 0)),  # packed scale/bias slab
            ],
            out_specs=pl.BlockSpec((pl.Squeezed(), C, tile), lambda b, n: (b, 0, n)),
            scratch_shapes=[pltpu.VMEM((H, tile), jnp.float32)],
        ),
        compiler_params=pltpu.CompilerParams(
            dimension_semantics=("parallel", "parallel"),
            vmem_limit_bytes=vmem_limit,
        ),
        cost_estimate=cost,
    )(x, w1, b1, w2p, pc)


def init_params(key, input_channels, hidden_channels):
    """Deterministic synthetic parameters matching the module's __init__ shapes."""
    C, H = input_channels, hidden_channels
    ks = jax.random.split(key, 12)
    return {
        "w1": jax.random.normal(ks[0], (H, C), jnp.float32) * 0.1,
        "b1": jax.random.normal(ks[1], (H, 1), jnp.float32) * 0.1,
        "w2": jax.random.normal(ks[2], (C, H), jnp.float32) * 0.1,
        "b2": jax.random.normal(ks[3], (C, 1), jnp.float32) * 0.1,
        "g1": 1.0 + 0.1 * jax.random.normal(ks[4], (C, 1), jnp.float32),
        "be1": 0.1 * jax.random.normal(ks[5], (C, 1), jnp.float32),
        "m1": 0.1 * jax.random.normal(ks[6], (C, 1), jnp.float32),
        "v1": jax.random.uniform(ks[7], (C, 1), jnp.float32, 0.5, 1.5),
        "g2": 1.0 + 0.1 * jax.random.normal(ks[8], (C, 1), jnp.float32),
        "be2": 0.1 * jax.random.normal(ks[9], (C, 1), jnp.float32),
        "m2": 0.1 * jax.random.normal(ks[10], (C, 1), jnp.float32),
        "v2": jax.random.uniform(ks[11], (C, 1), jnp.float32, 0.5, 1.5),
    }


def reference(x, p):
    """Pure-JAX reference of the eval-mode forward (unfused, matches PyTorch)."""
    x = x + x
    x = (x - p["m1"][None]) / jnp.sqrt(p["v1"][None] + EPS) * p["g1"][None] + p["be1"][None]
    h = jnp.einsum("hc,bcn->bhn", p["w1"], x) + p["b1"][None]
    h = jnp.maximum(h, 0.0)
    x2 = jnp.einsum("ch,bhn->bcn", p["w2"], h) + p["b2"][None]
    x = x + x2
    x = (x - p["m2"][None]) / jnp.sqrt(p["v2"][None] + EPS) * p["g2"][None] + p["be2"][None]
    return x


if __name__ == "__main__":
    # TODO(synk): training-mode dropout / batch-statistics BatchNorm are not
    # implemented; this kernel reproduces the eval-mode forward only.
    key = jax.random.PRNGKey(0)
    kx, kp, kx2, kx3 = jax.random.split(key, 4)

    # Primary small test: B=2, C=8, H=32, N=128 (lane-aligned, native layout).
    B, C, H, N = 2, 8, 32, 128
    x = jax.random.normal(kx, (B, C, N), jnp.float32)
    params = init_params(kp, C, H)

    out = jax.block_until_ready(shortcut_layer(x, params))
    ref = reference(x, params)
    assert out.shape == (B, C, N)
    assert jnp.allclose(out, ref, atol=1e-4, rtol=1e-4), float(jnp.max(jnp.abs(out - ref)))

    # Test 2: N not a multiple of 128 -> single full-extent (C, N) block per batch.
    N2 = 96
    x2 = jax.random.normal(kx2, (B, C, N2), jnp.float32)
    out2 = jax.block_until_ready(shortcut_layer(x2, params))
    ref2 = reference(x2, params)
    assert out2.shape == (B, C, N2)
    assert jnp.allclose(out2, ref2, atol=1e-4, rtol=1e-4), float(jnp.max(jnp.abs(out2 - ref2)))

    # Test 3: multi-tile grid with a non-dividing last block (Pallas masking path).
    N3 = 300
    x3 = jax.random.normal(kx3, (B, C, N3), jnp.float32)
    out3 = jax.block_until_ready(shortcut_layer(x3, params, max_tile=128))
    ref3 = reference(x3, params)
    assert out3.shape == (B, C, N3)
    assert jnp.allclose(out3, ref3, atol=1e-4, rtol=1e-4), float(jnp.max(jnp.abs(out3 - ref3)))

    print("KERNEL_OK")
</pallas_src>

<mosaic_0001>
module attributes {stable_mosaic.version = 11 : i64} {
  func.func @_shortcut_kernel(%arg0: i32, %arg1: i32, %arg2: memref<1x8x128xf32, #tpu.memory_space<vmem>>, %arg3: memref<32x8xf32, #tpu.memory_space<vmem>>, %arg4: memref<32x1xf32, #tpu.memory_space<vmem>>, %arg5: memref<8x32xf32, #tpu.memory_space<vmem>>, %arg6: memref<4x8x1xf32, #tpu.memory_space<vmem>>, %arg7: memref<1x8x128xf32, #tpu.memory_space<vmem>>, %arg8: memref<32x128xf32, #tpu.memory_space<vmem>>) attributes {dimension_semantics = [#tpu.dimension_semantics<parallel>, #tpu.dimension_semantics<parallel>], iteration_bounds = array<i64: 2, 1>, scalar_prefetch = 0 : i64, scratch_operands = 1 : i64, tpu.core_type = #tpu.core_type<tc>, window_params = [{transform_indices = @transform_0, window_bounds = array<i64: 1, 8, 128>}, {pipeline_mode = #tpu.pipeline_mode<synchronous>, transform_indices = @transform_1, window_bounds = array<i64: 32, 8>}, {pipeline_mode = #tpu.pipeline_mode<synchronous>, transform_indices = @transform_2, window_bounds = array<i64: 32, 1>}, {pipeline_mode = #tpu.pipeline_mode<synchronous>, transform_indices = @transform_3, window_bounds = array<i64: 8, 32>}, {pipeline_mode = #tpu.pipeline_mode<synchronous>, transform_indices = @transform_4, window_bounds = array<i64: 4, 8, 1>}, {transform_indices = @transform_5, window_bounds = array<i64: 1, 8, 128>}]} {
    %c0 = arith.constant 0 : index
    %c0_0 = arith.constant 0 : index
    %c0_1 = arith.constant 0 : index
    %0 = vector.load %arg2[%c0, %c0_0, %c0_1] : memref<1x8x128xf32, #tpu.memory_space<vmem>>, vector<1x8x128xf32>
    %1 = vector.shape_cast %0 : vector<1x8x128xf32> to vector<8x128xf32>
    %c0_2 = arith.constant 0 : index
    %c0_3 = arith.constant 0 : index
    %c0_4 = arith.constant 0 : index
    %2 = vector.load %arg6[%c0_2, %c0_3, %c0_4] : memref<4x8x1xf32, #tpu.memory_space<vmem>>, vector<1x8x1xf32>
    %3 = vector.shape_cast %2 : vector<1x8x1xf32> to vector<8x1xf32>
    %c1 = arith.constant 1 : index
    %c0_5 = arith.constant 0 : index
    %c0_6 = arith.constant 0 : index
    %4 = vector.load %arg6[%c1, %c0_5, %c0_6] : memref<4x8x1xf32, #tpu.memory_space<vmem>>, vector<1x8x1xf32>
    %5 = vector.shape_cast %4 : vector<1x8x1xf32> to vector<8x1xf32>
    %c2 = arith.constant 2 : index
    %c0_7 = arith.constant 0 : index
    %c0_8 = arith.constant 0 : index
    %6 = vector.load %arg6[%c2, %c0_7, %c0_8] : memref<4x8x1xf32, #tpu.memory_space<vmem>>, vector<1x8x1xf32>
    %7 = vector.shape_cast %6 : vector<1x8x1xf32> to vector<8x1xf32>
    %c3 = arith.constant 3 : index
    %c0_9 = arith.constant 0 : index
    %c0_10 = arith.constant 0 : index
    %8 = vector.load %arg6[%c3, %c0_9, %c0_10] : memref<4x8x1xf32, #tpu.memory_space<vmem>>, vector<1x8x1xf32>
    %9 = vector.shape_cast %8 : vector<1x8x1xf32> to vector<8x1xf32>
    %10 = vector.broadcast %3 : vector<8x1xf32> to vector<8x128xf32>
    %11 = arith.mulf %1, %10 : vector<8x128xf32>
    %12 = vector.broadcast %5 : vector<8x1xf32> to vector<8x128xf32>
    %13 = arith.addf %11, %12 : vector<8x128xf32>
    %c0_11 = arith.constant 0 : index
    %c0_12 = arith.constant 0 : index
    %14 = vector.load %arg3[%c0_11, %c0_12] : memref<32x8xf32, #tpu.memory_space<vmem>>, vector<32x8xf32>
    %cst = arith.constant dense<0.000000e+00> : vector<32x128xf32>
    %15 = tpu.matmul %14, %13, %cst {dimension_numbers = #tpu.dot_dimension_numbers<[1], [0], [0], [1], [0, 0, 1, 1], [], []>} : vector<32x8xf32>, vector<8x128xf32>, vector<32x128xf32> -> vector<32x128xf32>
    %c0_13 = arith.constant 0 : index
    %c0_14 = arith.constant 0 : index
    %16 = vector.load %arg4[%c0_13, %c0_14] : memref<32x1xf32, #tpu.memory_space<vmem>>, vector<32x1xf32>
    %17 = vector.broadcast %16 : vector<32x1xf32> to vector<32x128xf32>
    %18 = arith.addf %15, %17 : vector<32x128xf32>
    %cst_15 = arith.constant 0.000000e+00 : f32
    %19 = vector.broadcast %cst_15 : f32 to vector<32x128xf32>
    %20 = arith.maximumf %18, %19 : vector<32x128xf32>
    %c0_16 = arith.constant 0 : index
    %c0_17 = arith.constant 0 : index
    %21 = vector.load %arg8[%c0_16, %c0_17] : memref<32x128xf32, #tpu.memory_space<vmem>>, vector<32x128xf32>
    tpu.vector_store %arg8[%c0_16, %c0_17], %20 {strides = array<i32>} : memref<32x128xf32, #tpu.memory_space<vmem>>, vector<32x128xf32>,
    %22 = vector.broadcast %7 : vector<8x1xf32> to vector<8x128xf32>
    %23 = arith.mulf %13, %22 : vector<8x128xf32>
    %c0_18 = arith.constant 0 : index
    %c0_19 = arith.constant 0 : index
    %24 = vector.load %arg5[%c0_18, %c0_19] : memref<8x32xf32, #tpu.memory_space<vmem>>, vector<8x32xf32>
    %c0_20 = arith.constant 0 : index
    %c0_21 = arith.constant 0 : index
    %25 = vector.load %arg8[%c0_20, %c0_21] : memref<32x128xf32, #tpu.memory_space<vmem>>, vector<32x128xf32>
    %cst_22 = arith.constant dense<0.000000e+00> : vector<8x128xf32>
    %26 = tpu.matmul %24, %25, %cst_22 {dimension_numbers = #tpu.dot_dimension_numbers<[1], [0], [0], [1], [0, 0, 1, 1], [], []>} : vector<8x32xf32>, vector<32x128xf32>, vector<8x128xf32> -> vector<8x128xf32>
    %27 = arith.addf %23, %26 : vector<8x128xf32>
    %28 = vector.broadcast %9 : vector<8x1xf32> to vector<8x128xf32>
    %29 = arith.addf %27, %28 : vector<8x128xf32>
    %c0_23 = arith.constant 0 : index
    %c0_24 = arith.constant 0 : index
    %c0_25 = arith.constant 0 : index
    %30 = vector.load %arg7[%c0_23, %c0_24, %c0_25] : memref<1x8x128xf32, #tpu.memory_space<vmem>>, vector<1x8x128xf32>
    %31 = vector.shape_cast %30 : vector<1x8x128xf32> to vector<8x128xf32>
    %32 = vector.shape_cast %29 : vector<8x128xf32> to vector<1x8x128xf32>
    tpu.vector_store %arg7[%c0_23, %c0_24, %c0_25], %32 {strides = array<i32>} : memref<1x8x128xf32, #tpu.memory_space<vmem>>, vector<1x8x128xf32>,
    return
  }
  func.func @transform_0(%arg0: i32, %arg1: i32) -> (i32, i32, i32) {
    %c0_i32 = arith.constant 0 : i32
    %c0_i32_0 = arith.constant 0 : i32
    return %arg0, %c0_i32, %arg1 : i32, i32, i32
  }
  func.func @transform_1(%arg0: i32, %arg1: i32) -> (i32, i32) {
    %c0_i32 = arith.constant 0 : i32
    %c0_i32_0 = arith.constant 0 : i32
    %c0_i32_1 = arith.constant 0 : i32
    return %c0_i32, %c0_i32_0 : i32, i32
  }
  func.func @transform_2(%arg0: i32, %arg1: i32) -> (i32, i32) {
    %c0_i32 = arith.constant 0 : i32
    %c0_i32_0 = arith.constant 0 : i32
    %c0_i32_1 = arith.constant 0 : i32
    return %c0_i32, %c0_i32_0 : i32, i32
  }
  func.func @transform_3(%arg0: i32, %arg1: i32) -> (i32, i32) {
    %c0_i32 = arith.constant 0 : i32
    %c0_i32_0 = arith.constant 0 : i32
    %c0_i32_1 = arith.constant 0 : i32
    return %c0_i32, %c0_i32_0 : i32, i32
  }
  func.func @transform_4(%arg0: i32, %arg1: i32) -> (i32, i32, i32) {
    %c0_i32 = arith.constant 0 : i32
    %c0_i32_0 = arith.constant 0 : i32
    %c0_i32_1 = arith.constant 0 : i32
    %c0_i32_2 = arith.constant 0 : i32
    return %c0_i32, %c0_i32_0, %c0_i32_1 : i32, i32, i32
  }
  func.func @transform_5(%arg0: i32, %arg1: i32) -> (i32, i32, i32) {
    %c0_i32 = arith.constant 0 : i32
    %c0_i32_0 = arith.constant 0 : i32
    return %arg0, %c0_i32, %arg1 : i32, i32, i32
  }
}

</mosaic_0001>

<bundles_post_ra>
// kernel: shortcut_layer.1
= control target key start
LH: loop header
LB: loop body
LE: loop exit
PB: predicated region body
PF: predicated region fallthrough
CT: control target
= control target key end

     0   :  { %10 = vsyncpa [#allocation4], 0  ;;  %s801_s0 = inlined_call_operand.vmem [shape: f32[2,8,128], index: 0, kind: input, shape index: {}]   ;;  %s802_s1 = inlined_call_operand.vmem [shape: f32[32,8], index: 1, kind: input, shape index: {}]   ;;  %s803_s2 = inlined_call_operand.vmem [shape: f32[32,1], index: 2, kind: input, shape index: {}]   ;;  %s804_s3 = inlined_call_operand.vmem [shape: f32[8,32], index: 3, kind: input, shape index: {}]   ;;  %s805_s4 = inlined_call_operand.vmem [shape: f32[4,8,1], index: 4, kind: input, shape index: {}]   ;;  %s806_s5 = inlined_call_operand.hbm [shape: f32[2,8,128], index: 5, kind: output, shape index: {}]  }
   0x1   :  { %12 = vsyncpa [#allocation4 + $0x1], 0  ;;  %s665_s18 = smov 0   ;;  %s667_s19 = smov 0  }
   0x2   :  { %s669_s20 = smov 0   ;;  %s671_s21 = smov 0  }
   0x3   :  { %s673_s22 = smov 0   ;;  %s675_s23 = smov 0  }
   0x4 LB: > { %s474_s24 = sadd.s32 4294967295, %s632_s23   ;;  %s475_s25 = sadd.s32 4294967294, %s632_s23   ;;  %s632_s23 = sphi %s675_s23, %s18_s23   ;;  %s628_s22 = sphi %s673_s22, %s813_s22   ;;  %s624_s21 = sphi %s671_s21, %s812_s21   ;;  %s620_s20 = sphi %s669_s20, %s811_s20   ;;  %s616_s19 = sphi %s667_s19, %s810_s19   ;;  %s612_s18 = sphi %s665_s18, %s809_s18  }
   0x5   : > { %s30_s26 = sadd.s32 1, %s628_s22  ;;  %s151_s27 = sadd.s32 1, %s620_s20 }
   0x6   : > { %p32_p0 = scmp.ge.s32.totalorder %s30_s26, 2  ;;  %p161_p1 = scmp.ne.s32.totalorder %s620_s20, %s616_s19 }
   0x7   : > { %p162_p2 = scmp.eq.s32.totalorder %s474_s24, 1  ;;  %p167_p3 = scmp.ne.s32.totalorder %s616_s19, %s612_s18 }
   0x8   : > { %s815_s26 = smov (%p32_p0, %s30_s26), 0  ;;  %p168_p5 = scmp.eq.s32.totalorder %s475_s25, 1 }
   0x9   : > { %p705_p4 = por %p162_p2, %p161_p1  ;;  %s146_s29 = ssub.s32 %s628_s22, %s815_s26 }
   0xa   : > { %p478_p6 = scmp.ge.s32.totalorder %s632_s23, 1  ;;  %p149_p7 = scmp.eq.s32.totalorder %s146_s29, 0 }
   0xb   : > { %p712_p8 = por %p168_p5, %p167_p3  ;;  %p208_p9 = scmp.lt.s32.totalorder %s632_s23, 3 }
   0xc   : > { %s718_s6 = scalar_select %p149_p7, %s620_s20, %s151_s27  }
   0xd   : > { %p209_p10 = pnand %p478_p6, %p208_p9 }
   0xe   : > { %p238_p11 = scmp.lt.s32.totalorder (!%p209_p10), %s624_s21, 1  ;;  %s235_s8 = sand.u32 (!%p209_p10), 1, %s616_s19  }
   0xf   : > { %212 = sbr.rel (%p209_p10) target bundleno = 430 (0x1ae), region = 40  ;;  %s490_s10 = sshll.u32 (!%p209_p10), %s624_s21, 3 }
  0x10   : > { %s398_s13 = scalar_lea.hbm (!%p209_p10), %s806_s5, %s490_s10  ;;  %s387_s17 = scalar_lea.sflag (!%p209_p10), [#allocation4], %s235_s8 }
  0x11   : > { %s402_s16 = sshll.u32 (!%p209_p10), %s398_s13, 4  ;;  %s574_s29 = scalar_lea.hbm (!%p209_p10), %s806_s5, 16  ;;  %s403_s16 = int_to_ptr.hbm [resolvable:$true] %s402_s16 }
  0x12   : > { %s568_s24 = sshra.s32 (!%p209_p10), %s403_s16, 4  ;;  %s569_s24 = int_to_ptr.hbm [resolvable:$true] %s568_s24 }
  0x13   : > { %p575_p1 = scmp.lt.s32.totalorder (!%p209_p10), %s569_s24, %s806_s5 }
  0x14   : > { %v246_v0 = vld [vmem:[%s805_s4] sm:$0xff]  ;;  %v634_v1 = vmov 0   ;;  %v481_v2 = vld [vmem:[%s805_s4 + $0x8] sm:$0xff]  ;;  %v482_v3 = vld [vmem:[%s805_s4 + $0x10] sm:$0xff]  ;;  %s239_s25 = scalar_select %p238_p11, %s624_s21, 1  ;;  %vm293_vm0 = vcmask 64512  }
  0x15   : > { %551 = vset.pattern.permute.xlu0 %v634_v1  ;;  %552 = vset.pattern.permute.xlu1 %v634_v1  ;;  %v272_v4 = vld [vmem:[%s803_s2 + $0x18] sm:$0xff]  ;;  %v271_v5 = vld [vmem:[%s803_s2 + $0x10] sm:$0xff]  ;;  %v270_v6 = vld [vmem:[%s803_s2 + $0x8] sm:$0xff]  ;;  %vm354_vm1 = vcmask 261120   ;;  %s570_s21 = scalar_lea.hbm %s569_s24, 8 }
  0x16   : > { %255 = vperm.xlu0 %551, %v246_v0   ;;  %553 = vset.pattern.permute.xlu2 %v634_v1  ;;  %v483_v7 = vld [vmem:[%s805_s4 + $0x18] sm:$0xff]  ;;  %v269_v8 = vld [vmem:[%s803_s2] sm:$0xff]  ;;  %s480_s9 = sshll.u32 %s239_s25, 3  ;;  %v266_v14 = vld [vmem:[%s802_s1 + $0x8] sm:$0xff]  ;;  %p571_p12 = scmp.ne.s32.totalorder %s569_s24, %s570_s21 }
  0x17   : > { %290 = vperm.xlu1 %552, %v272_v4   ;;  %280 = vperm.xlu2 %553, %v270_v6   ;;  %s244_s12 = scalar_lea.vmem %s801_s0, %s480_s9  ;;  %v268_v15 = vld [vmem:[%s802_s1 + $0x18] sm:$0xff]  ;;  %v265_v16 = vld [vmem:[%s802_s1] sm:$0xff]  ;;  %v267_v17 = vld [vmem:[%s802_s1 + $0x10] sm:$0xff]  ;;  %s479_s9 = sshll.u32 %s235_s8, 3 }
  0x18   : > { %v245_v10 = vld [vmem:[%s244_s12] sm:$0xff]  ;;  %s237_s14 = scalar_lea.vmem [#allocation3], %s479_s9  ;;  %p572_p13 = pnand %p571_p12, %p705_p4 }
  0x19   : > { %v349_v34 = vld [vmem:[%s804_s3] sm:$0xff]  ;;  %s400_s15 = sshll.u32 %s237_s14, 4  ;;  %p576_p2 = scmp.lt.s32.totalorder %s574_s29, %s570_s21  ;;  %s401_s15 = int_to_ptr.vmem [resolvable:$true] %s400_s15 }
  0x1a   : > { %p573_p0 = pneg %p572_p13 }
  0x1b   : > { %p577_p3 = por %p576_p2, %p575_p1 }
  0x1d   : > { %p578_p5 = pnand %p577_p3, %p573_p0 }
  0x1e   : > { %261 = vperm.xlu0 %551, %v481_v2  }
  0x1f   : > { %285 = vperm.xlu1 %552, %v271_v5   ;;  %275 = vperm.xlu2 %553, %v269_v8  }
  0x26   : > { %345 = vperm.xlu0 %551, %v482_v3  }
  0x27   : > { %381 = vperm.xlu1 %552, %v483_v7  }
  0x71   : > { %v281_v19 = vpop.permute.xlu2 %280 }
  0x79   : > { %v276_v25 = vpop.permute.xlu2 %275 }
  0x88   : > { %v256_v9 = vpop.permute.xlu0 %255 }
  0x89   : > { %v258_v11 = vmul.f32 %v256_v9, %v245_v10  ;;  %v291_v18 = vpop.permute.xlu1 %290 }
  0x90   : > { %v262_v12 = vpop.permute.xlu0 %261 }
  0x91   : > { %v264_v13 = vadd.f32 %v262_v12, %v258_v11  ;;  %v286_v24 = vpop.permute.xlu1 %285 }
  0x93   : > { %321 = vmatpush.msra.mxu0 %v264_v13  ;;  %493 = vmatpush.msra.mxu2 %v264_v13 }
  0x94   : > { %494 = vmatpush.msra.mxu3 %v264_v13  ;;  %485 = vmatmul.msk.f32.vlgmr.msra.gmra.mxu2 %vm293_vm0, %v266_v14 }
  0x95   : > { %487 = vmatmul.msk.f32.vlgmr.msra.gmra.mxu3 %vm293_vm0, %v268_v15  ;;  %484 = vmatmul.msk.f32.vlgmr.msra.gmra.mxu0 %vm293_vm0, %v265_v16 }
  0x98   : > { %v346_v35 = vpop.permute.xlu0 %345 }
  0x99   : > { %v348_v36 = vmul.f32 %v346_v35, %v264_v13  ;;  %v382_v39 = vpop.permute.xlu1 %381 }
  0x9c   : > { %486 = vmatmul.msk.f32.gmra.mxu2 %vm293_vm0, %v267_v17 }
 0x112   : > { %v323_v26 = vpop.f32.mrf.mxu0 }
 0x113   : > { %v324_v30 = vadd.f32 %v323_v26, %v276_v25 }
 0x115   : > { %v335_v33 = vmax.f32 %v324_v30, 0.0 }
 0x117   : > { %v326_v20 = vpop.f32.mrf.mxu2 }
 0x118   : > { %v332_v21 = vpop.f32.mrf.mxu3  ;;  %v327_v28 = vadd.f32 %v326_v20, %v281_v19 }
 0x119   : > { %v333_v22 = vadd.f32 %v332_v21, %v291_v18 }
 0x11a   : > { %v336_v32 = vmax.f32 %v327_v28, 0.0 }
 0x11b   : > { %v338_v23 = vmax.f32 %v333_v22, 0.0 }
 0x11d   : > { %370 = vmatpush.msra.mxu1 %v338_v23 }
 0x11f   : > { %v329_v27 = vpop.f32.mrf.mxu2 }
 0x120   : > { %v330_v29 = vadd.f32 %v329_v27, %v286_v24 }
 0x122   : > { %v337_v31 = vmax.f32 %v330_v29, 0.0 }
 0x124   : > { %371 = vmatpush.msra.mxu1 %v337_v31 }
 0x126   : > { %372 = vmatpush.msra.mxu1 %v336_v32 }
 0x128   : > { %373 = vmatpush.msra.mxu1 %v335_v33 }
 0x129   : > { %488 = vmatmul.msk.f32.vlgmr.msra.gmra.mxu1 %vm354_vm1, %v349_v34 }
 0x1a6   : > { %v375_v37 = vpop.f32.mrf.mxu1 }
 0x1a7   : > { %v378_v38 = vadd.f32 %v375_v37, %v348_v36 }
 0x1a9   : > { %v384_v40 = vadd.f32 %v382_v39, %v378_v38 }
 0x1ab   : > { %385 = vst [vmem:[%s237_s14] sm:$0xff] %v384_v40 }
 0x1ac   : > { %581 = shalt.err (!%p578_p5)
}
 0x1ad   : > { %495 = dma.vmem_to_hbm [thread:$0]  (%p705_p4), %s401_s15, 128, %s403_s16, %s387_s17  }
 0x1ae PF: > { %p501_p6 = scmp.ge.s32.totalorder %s632_s23, 2  ;;  %s414_s8 = sand.u32 1, %s612_s18  }
 0x1af   : > { %s415_s10 = scalar_lea.sflag [#allocation4], %s414_s8 }
 0x1b0   : > { %p498_p7 = pnand %p501_p6, %p712_p8 }
 0x1b2   : > { %p499_p9 = pneg %p498_p7 }
 0x1b4   : > { %607 = dma.done.wait (%p499_p9), %s415_s10, 128  }
 0x1b5   : > { %609 = vsyncadd (%p499_p9), %s415_s10, 4294967168  ;;  %s18_s23 = sadd.s32 1, %s632_s23   ;;  %s809_s18 = smov %s616_s19 }
 0x1b6   : > { %p15_p10 = scmp.ge.s32.totalorder %s18_s23, 4   ;;  %s810_s19 = smov %s620_s20 }
 0x1b7   : > { %s811_s20 = smov %s718_s6  ;;  %s812_s21 = smov %s628_s22 }
 0x1b8   : > { %s813_s22 = smov %s815_s26  ;;  %17 = sbr.rel (!%p15_p10) target bundleno = 4 (0x4), region = 78 }
 0x1bd   :  { %421 = vsyncpa [#allocation4], 1 }
 0x1be   :  { %423 = vsyncpa [#allocation4 + $0x1], 1 }

</bundles_post_ra>
